<compile_context>
chip_gen: v7x
topology: tpu7x:2x2x1
jax: 0.10.0
libtpu: 0.0.40
codegen_flags: <defaults>
</compile_context>

<pallas_src>
import functools

import jax
import jax.numpy as jnp
from jax import lax
from jax.experimental import pallas as pl
from jax.experimental.pallas import tpu as pltpu


# --------------------------------------------------------------------------
# helpers
# --------------------------------------------------------------------------
def _round_up(x, m):
    return (x + m - 1) // m * m


def _tile_b(batch):
    # <=128 rows per tile keeps the unrolled gather-DMA count / outstanding
    # DMAs bounded, and 128 keeps the lane-dense (1, tile) blocks a multiple
    # of 128 lanes when the grid has more than one tile.
    if batch >= 128:
        return 128
    return _round_up(max(batch, 8), 8)


def _vmem_limit(tile_b, dim, n_big_bufs):
    need = n_big_bufs * tile_b * dim * 4 + (1 << 20)
    return int(min(max(2 * need, 8 << 20), 32 << 20))


def _gather_center_rows(y_sref, centers_hbm, gather_buf, sems, base, tile_b):
    """DMA-gather centers[y[base + r]] -> gather_buf[r] for r in [0, tile_b)."""
    # Read all SMEM label scalars and issue all row DMAs first, then wait.
    for r in range(tile_b):
        row = y_sref[base + r]
        pltpu.make_async_copy(centers_hbm.at[pl.ds(row, 1)],
                              gather_buf.at[pl.ds(r, 1)],
                              sems.at[r]).start()
    for r in range(tile_b):
        pltpu.make_async_copy(centers_hbm.at[pl.ds(0, 1)],
                              gather_buf.at[pl.ds(r, 1)],
                              sems.at[r]).wait()


# --------------------------------------------------------------------------
# Kernel 1: ind is None  ->  scalar loss (accumulated across batch tiles)
# --------------------------------------------------------------------------
def _center_loss_kernel(y_sref, hidden_ref, centers_hbm, out_ref,
                        gather_buf, sems, *, lambda_c, tile_b, batch):
    i = pl.program_id(0)

    @pl.when(i == 0)
    def _():
        out_ref[...] = jnp.zeros_like(out_ref)

    _gather_center_rows(y_sref, centers_hbm, gather_buf, sems, i * tile_b, tile_b)

    e = gather_buf[...].astype(jnp.float32)                  # (TB, D)
    h = hidden_ref[...].astype(jnp.float32)                  # (TB, D)

    # 1 / clamp(norm, min=1)  ==  min(rsqrt(sum sq), 1)   (rsqrt(0)=inf -> 1)
    c_sq = jnp.sum(e * e, axis=1, keepdims=True)             # (TB, 1)
    f_sq = jnp.sum(h * h, axis=1, keepdims=True)
    inv_c = jnp.minimum(lax.rsqrt(c_sq), 1.0)
    inv_f = jnp.minimum(lax.rsqrt(f_sq), 1.0)

    d = h - e
    row_sq = jnp.sum(d * d, axis=1, keepdims=True)           # (TB, 1)

    # mask rows that are only padding (batch rounded up to tile_b)
    rows = i * tile_b + lax.broadcasted_iota(jnp.int32, (tile_b, 1), 0)
    valid = (rows < batch).astype(jnp.float32)

    contrib = row_sq * inv_f * inv_c * valid                 # (TB, 1)
    tile_sum = jnp.sum(contrib, axis=0, keepdims=True)       # (1, 1)

    out_ref[...] += (lambda_c / 2.0 / batch) * tile_sum


def center_loss(y, hidden, centers, lambda_c=1.0):
    """CenterLoss.forward(y, hidden) with ind=None -> scalar loss."""
    B, D = hidden.shape
    C = centers.shape[0]
    tb = _tile_b(B)
    b_pad = _round_up(B, tb)
    nb = b_pad // tb

    # Clip labels so the gather DMA is always in-bounds.
    # (PyTorch index_select would raise on out-of-range labels instead.)
    y_c = jnp.clip(y.astype(jnp.int32).reshape(-1), 0, C - 1)
    if b_pad != B:
        y_c = jnp.pad(y_c, (0, b_pad - B))
        hidden = jnp.pad(hidden, ((0, b_pad - B), (0, 0)))

    kernel = functools.partial(_center_loss_kernel, lambda_c=float(lambda_c),
                               tile_b=tb, batch=B)
    out = pl.pallas_call(
        kernel,
        out_shape=jax.ShapeDtypeStruct((1, 1), jnp.float32),
        grid_spec=pltpu.PrefetchScalarGridSpec(
            num_scalar_prefetch=1,
            grid=(nb,),
            in_specs=[
                pl.BlockSpec((tb, D), lambda i, y_s: (i, 0)),   # hidden tile
                pl.BlockSpec(memory_space=pl.ANY),              # centers in HBM
            ],
            out_specs=pl.BlockSpec((1, 1), lambda i, y_s: (0, 0)),
            scratch_shapes=[
                pltpu.VMEM((tb, D), centers.dtype),             # gathered rows
                pltpu.SemaphoreType.DMA((tb,)),
            ],
        ),
        compiler_params=pltpu.CompilerParams(
            dimension_semantics=("arbitrary",),                 # accumulator axis
            vmem_limit_bytes=_vmem_limit(tb, D, 4),
        ),
    )(y_c, hidden, centers)
    return out[0, 0]


# --------------------------------------------------------------------------
# Kernel 2: ind is not None -> (per-sample loss, expanded_centers, weighted)
# --------------------------------------------------------------------------
def _center_loss_ind_kernel(y_sref, hidden_ref, ind_ref, w_ref, centers_hbm,
                            loss_ref, wloss_ref, exp_ref,
                            gather_buf, sems, *, lambda_c, tile_b):
    i = pl.program_id(0)
    _gather_center_rows(y_sref, centers_hbm, gather_buf, sems, i * tile_b, tile_b)

    e = gather_buf[...]                                       # (TB, D) centers dtype
    h = hidden_ref[...].astype(jnp.float32)
    d = h - e.astype(jnp.float32)

    intra = jnp.sum(d * d, axis=1)                            # (TB,)
    intra = intra.reshape(1, tile_b) * ind_ref[...]           # lane-dense (1, TB)

    loss = (lambda_c * 0.5) * intra
    loss_ref[...] = loss
    wloss_ref[...] = loss * w_ref[...]                        # fused weights mul
    exp_ref[...] = e.astype(exp_ref.dtype)


def center_loss_with_ind(y, hidden, ind, centers, weights=None, lambda_c=1.0):
    """CenterLoss.forward(y, hidden, ind, weights) -> (loss, expanded, weighted)."""
    B, D = hidden.shape
    C = centers.shape[0]
    tb = _tile_b(B)
    b_pad = _round_up(B, tb)
    nb = b_pad // tb

    y_c = jnp.clip(y.astype(jnp.int32).reshape(-1), 0, C - 1)
    h_pad = hidden
    ind_r = ind.astype(jnp.float32).reshape(-1)
    w_r = (jnp.ones((B,), jnp.float32) if weights is None
           else weights.astype(jnp.float32).reshape(-1))
    if b_pad != B:
        y_c = jnp.pad(y_c, (0, b_pad - B))
        h_pad = jnp.pad(h_pad, ((0, b_pad - B), (0, 0)))
        ind_r = jnp.pad(ind_r, (0, b_pad - B))
        w_r = jnp.pad(w_r, (0, b_pad - B))
    ind_row = ind_r.reshape(1, b_pad)                         # lane-dense inputs
    w_row = w_r.reshape(1, b_pad)

    kernel = functools.partial(_center_loss_ind_kernel, lambda_c=float(lambda_c),
                               tile_b=tb)
    loss_row, wloss_row, expanded = pl.pallas_call(
        kernel,
        out_shape=(jax.ShapeDtypeStruct((1, b_pad), jnp.float32),
                   jax.ShapeDtypeStruct((1, b_pad), jnp.float32),
                   jax.ShapeDtypeStruct((b_pad, D), centers.dtype)),
        grid_spec=pltpu.PrefetchScalarGridSpec(
            num_scalar_prefetch=1,
            grid=(nb,),
            in_specs=[
                pl.BlockSpec((tb, D), lambda i, y_s: (i, 0)),   # hidden tile
                pl.BlockSpec((1, tb), lambda i, y_s: (0, i)),   # ind (lane-dense)
                pl.BlockSpec((1, tb), lambda i, y_s: (0, i)),   # weights
                pl.BlockSpec(memory_space=pl.ANY),              # centers in HBM
            ],
            out_specs=(pl.BlockSpec((1, tb), lambda i, y_s: (0, i)),
                       pl.BlockSpec((1, tb), lambda i, y_s: (0, i)),
                       pl.BlockSpec((tb, D), lambda i, y_s: (i, 0))),
            scratch_shapes=[
                pltpu.VMEM((tb, D), centers.dtype),
                pltpu.SemaphoreType.DMA((tb,)),
            ],
        ),
        compiler_params=pltpu.CompilerParams(
            dimension_semantics=("parallel",),                  # independent tiles
            vmem_limit_bytes=_vmem_limit(tb, D, 6),
        ),
    )(y_c, h_pad, ind_row, w_row, centers)

    loss = loss_row[0, :B].reshape(B, 1)
    expanded = expanded[:B]
    weighted = None if weights is None else wloss_row[0, :B].reshape(B, 1)
    return loss, expanded, weighted


# --------------------------------------------------------------------------
# Pure-JAX references (mirror the PyTorch code) for sanity checks.
# --------------------------------------------------------------------------
def _ref_center_loss(y, hidden, centers, lambda_c=1.0):
    B = hidden.shape[0]
    expanded = centers[y]
    c_norm = jnp.maximum(jnp.linalg.norm(expanded, axis=1, keepdims=True), 1.0)
    f_norm = jnp.maximum(jnp.linalg.norm(hidden, axis=1, keepdims=True), 1.0)
    intra = jnp.sum((hidden - expanded) ** 2 / f_norm / c_norm)
    return lambda_c / 2.0 / B * intra


def _ref_center_loss_ind(y, hidden, ind, centers, lambda_c=1.0):
    B = hidden.shape[0]
    expanded = centers[y]
    intra = jnp.sum((hidden - expanded) ** 2, axis=1).reshape(B, 1) * ind.reshape(B, 1)
    return lambda_c / 2.0 * intra, expanded


if __name__ == "__main__":
    key = jax.random.PRNGKey(0)
    k_c, k_h, k_y, k_i, k_w = jax.random.split(key, 5)

    batch, dim_hidden, num_classes = 8, 32, 16
    lambda_c = 1.0

    centers = jax.random.normal(k_c, (num_classes, dim_hidden), dtype=jnp.float32)
    hidden = jax.random.normal(k_h, (batch, dim_hidden), dtype=jnp.float32)
    y = jax.random.randint(k_y, (batch,), 0, num_classes, dtype=jnp.int32)
    ind = jax.random.uniform(k_i, (batch,), dtype=jnp.float32)
    weights = jax.random.uniform(k_w, (batch,), dtype=jnp.float32)

    # --- branch 1: ind is None -> scalar loss ---
    loss = jax.block_until_ready(center_loss(y, hidden, centers, lambda_c))
    loss_ref = _ref_center_loss(y, hidden, centers, lambda_c)
    assert jnp.allclose(loss, loss_ref, rtol=1e-4, atol=1e-5), (loss, loss_ref)

    # --- branch 2: ind given -> (loss, expanded_centers, weighted_center) ---
    loss_i, expanded, weighted = center_loss_with_ind(
        y, hidden, ind, centers, weights=weights, lambda_c=lambda_c)
    jax.block_until_ready((loss_i, expanded, weighted))
    loss_i_ref, expanded_ref = _ref_center_loss_ind(y, hidden, ind, centers, lambda_c)
    assert jnp.allclose(loss_i, loss_i_ref, rtol=1e-5, atol=1e-5)
    assert jnp.allclose(expanded, expanded_ref, rtol=1e-5, atol=1e-5)
    assert jnp.allclose(weighted, loss_i_ref * weights.reshape(batch, 1),
                        rtol=1e-5, atol=1e-5)

    # --- exercise the multi-tile / padded / accumulating path (still tiny) ---
    batch2, classes2 = 160, 24
    k2 = jax.random.split(key, 4)
    centers2 = jax.random.normal(k2[0], (classes2, dim_hidden), dtype=jnp.float32)
    hidden2 = jax.random.normal(k2[1], (batch2, dim_hidden), dtype=jnp.float32)
    y2 = jax.random.randint(k2[2], (batch2,), 0, classes2, dtype=jnp.int32)
    ind2 = jax.random.uniform(k2[3], (batch2,), dtype=jnp.float32)

    loss2 = jax.block_until_ready(center_loss(y2, hidden2, centers2, lambda_c))
    assert jnp.allclose(loss2, _ref_center_loss(y2, hidden2, centers2, lambda_c),
                        rtol=1e-4, atol=1e-5)

    loss2_i, exp2, w2 = center_loss_with_ind(y2, hidden2, ind2, centers2, None, lambda_c)
    jax.block_until_ready((loss2_i, exp2))
    loss2_i_ref, exp2_ref = _ref_center_loss_ind(y2, hidden2, ind2, centers2, lambda_c)
    assert w2 is None
    assert jnp.allclose(loss2_i, loss2_i_ref, rtol=1e-5, atol=1e-5)
    assert jnp.allclose(exp2, exp2_ref, rtol=1e-5, atol=1e-5)

    print("KERNEL_OK")
</pallas_src>

<mosaic_0001>
module attributes {stable_mosaic.version = 11 : i64} {
  func.func @_center_loss_kernel(%arg0: i32, %arg1: memref<8xi32, #tpu.memory_space<smem>>, %arg2: memref<8x32xf32, #tpu.memory_space<vmem>>, %arg3: memref<16x32xf32, #tpu.memory_space<any>>, %arg4: memref<1x1xf32, #tpu.memory_space<vmem>>, %arg5: memref<8x32xf32, #tpu.memory_space<vmem>>, %arg6: memref<8x!tpu.dma_semaphore, #tpu.memory_space<semaphore_mem>>) attributes {dimension_semantics = [#tpu.dimension_semantics<arbitrary>], iteration_bounds = array<i64: 1>, scalar_prefetch = 1 : i64, scratch_operands = 2 : i64, tpu.core_type = #tpu.core_type<tc>, window_params = [{transform_indices = @transform_0, window_bounds = array<i64: 8, 32>}, {}, {pipeline_mode = #tpu.pipeline_mode<synchronous>, transform_indices = @transform_2, window_bounds = array<i64: 1, 1>}]} {
    %c0_i32 = arith.constant 0 : i32
    %0 = arith.cmpi eq, %arg0, %c0_i32 : i32
    %1 = arith.extui %0 : i1 to i32
    %c0_i32_0 = arith.constant 0 : i32
    %2 = arith.cmpi ne, %1, %c0_i32_0 : i32
    scf.if %2 {
      %cst_89 = arith.constant 0.000000e+00 : f32
      %128 = vector.broadcast %cst_89 : f32 to vector<1x1xf32>
      %c0_90 = arith.constant 0 : index
      %c0_91 = arith.constant 0 : index
      %129 = vector.load %arg4[%c0_90, %c0_91] : memref<1x1xf32, #tpu.memory_space<vmem>>, vector<1x1xf32>
      tpu.vector_store %arg4[%c0_90, %c0_91], %128 {strides = array<i32>} : memref<1x1xf32, #tpu.memory_space<vmem>>, vector<1x1xf32>,
    } else {
    }
    %c8_i32 = arith.constant 8 : i32
    %3 = arith.muli %arg0, %c8_i32 : i32
    %c0_i32_1 = arith.constant 0 : i32
    %4 = arith.addi %3, %c0_i32_1 : i32
    %5 = arith.index_cast %4 : i32 to index
    %6 = memref.load %arg1[%5] : memref<8xi32, #tpu.memory_space<smem>>
    %c0_i32_2 = arith.constant 0 : i32
    %c0_i32_3 = arith.constant 0 : i32
    %7 = tpu.memref_slice %arg3[%6, %c0_i32_3] : memref<16x32xf32, #tpu.memory_space<any>> -> memref<1x32xf32, #tpu.memory_space<any>>
    %c0_i32_4 = arith.constant 0 : i32
    %c0_i32_5 = arith.constant 0 : i32
    %8 = tpu.memref_slice %arg5[%c0_i32_4, %c0_i32_5] : memref<8x32xf32, #tpu.memory_space<vmem>> -> memref<1x32xf32, #tpu.memory_space<vmem>>
    %9 = tpu.memref_slice %arg6[%c0_i32_2] : memref<8x!tpu.dma_semaphore, #tpu.memory_space<semaphore_mem>> -> memref<1x!tpu.dma_semaphore, #tpu.memory_space<semaphore_mem>>
    %10 = tpu.memref_squeeze %9 : memref<1x!tpu.dma_semaphore, #tpu.memory_space<semaphore_mem>> -> memref<!tpu.dma_semaphore, #tpu.memory_space<semaphore_mem>>
    tpu.enqueue_dma source(%7 : memref<1x32xf32, #tpu.memory_space<any>>) target(%8 : memref<1x32xf32, #tpu.memory_space<vmem>>) target_semaphore(%10 : memref<!tpu.dma_semaphore, #tpu.memory_space<semaphore_mem>>)
    %c1_i32 = arith.constant 1 : i32
    %11 = arith.addi %3, %c1_i32 : i32
    %12 = arith.index_cast %11 : i32 to index
    %13 = memref.load %arg1[%12] : memref<8xi32, #tpu.memory_space<smem>>
    %c1_i32_6 = arith.constant 1 : i32
    %c0_i32_7 = arith.constant 0 : i32
    %14 = tpu.memref_slice %arg3[%13, %c0_i32_7] : memref<16x32xf32, #tpu.memory_space<any>> -> memref<1x32xf32, #tpu.memory_space<any>>
    %c1_i32_8 = arith.constant 1 : i32
    %c0_i32_9 = arith.constant 0 : i32
    %15 = tpu.memref_slice %arg5[%c1_i32_8, %c0_i32_9] : memref<8x32xf32, #tpu.memory_space<vmem>> -> memref<1x32xf32, #tpu.memory_space<vmem>>
    %16 = tpu.memref_slice %arg6[%c1_i32_6] : memref<8x!tpu.dma_semaphore, #tpu.memory_space<semaphore_mem>> -> memref<1x!tpu.dma_semaphore, #tpu.memory_space<semaphore_mem>>
    %17 = tpu.memref_squeeze %16 : memref<1x!tpu.dma_semaphore, #tpu.memory_space<semaphore_mem>> -> memref<!tpu.dma_semaphore, #tpu.memory_space<semaphore_mem>>
    tpu.enqueue_dma source(%14 : memref<1x32xf32, #tpu.memory_space<any>>) target(%15 : memref<1x32xf32, #tpu.memory_space<vmem>>) target_semaphore(%17 : memref<!tpu.dma_semaphore, #tpu.memory_space<semaphore_mem>>)
    %c2_i32 = arith.constant 2 : i32
    %18 = arith.addi %3, %c2_i32 : i32
    %19 = arith.index_cast %18 : i32 to index
    %20 = memref.load %arg1[%19] : memref<8xi32, #tpu.memory_space<smem>>
    %c2_i32_10 = arith.constant 2 : i32
    %c0_i32_11 = arith.constant 0 : i32
    %21 = tpu.memref_slice %arg3[%20, %c0_i32_11] : memref<16x32xf32, #tpu.memory_space<any>> -> memref<1x32xf32, #tpu.memory_space<any>>
    %c2_i32_12 = arith.constant 2 : i32
    %c0_i32_13 = arith.constant 0 : i32
    %22 = tpu.memref_slice %arg5[%c2_i32_12, %c0_i32_13] : memref<8x32xf32, #tpu.memory_space<vmem>> -> memref<1x32xf32, #tpu.memory_space<vmem>>
    %23 = tpu.memref_slice %arg6[%c2_i32_10] : memref<8x!tpu.dma_semaphore, #tpu.memory_space<semaphore_mem>> -> memref<1x!tpu.dma_semaphore, #tpu.memory_space<semaphore_mem>>
    %24 = tpu.memref_squeeze %23 : memref<1x!tpu.dma_semaphore, #tpu.memory_space<semaphore_mem>> -> memref<!tpu.dma_semaphore, #tpu.memory_space<semaphore_mem>>
    tpu.enqueue_dma source(%21 : memref<1x32xf32, #tpu.memory_space<any>>) target(%22 : memref<1x32xf32, #tpu.memory_space<vmem>>) target_semaphore(%24 : memref<!tpu.dma_semaphore, #tpu.memory_space<semaphore_mem>>)
    %c3_i32 = arith.constant 3 : i32
    %25 = arith.addi %3, %c3_i32 : i32
    %26 = arith.index_cast %25 : i32 to index
    %27 = memref.load %arg1[%26] : memref<8xi32, #tpu.memory_space<smem>>
    %c3_i32_14 = arith.constant 3 : i32
    %c0_i32_15 = arith.constant 0 : i32
    %28 = tpu.memref_slice %arg3[%27, %c0_i32_15] : memref<16x32xf32, #tpu.memory_space<any>> -> memref<1x32xf32, #tpu.memory_space<any>>
    %c3_i32_16 = arith.constant 3 : i32
    %c0_i32_17 = arith.constant 0 : i32
    %29 = tpu.memref_slice %arg5[%c3_i32_16, %c0_i32_17] : memref<8x32xf32, #tpu.memory_space<vmem>> -> memref<1x32xf32, #tpu.memory_space<vmem>>
    %30 = tpu.memref_slice %arg6[%c3_i32_14] : memref<8x!tpu.dma_semaphore, #tpu.memory_space<semaphore_mem>> -> memref<1x!tpu.dma_semaphore, #tpu.memory_space<semaphore_mem>>
    %31 = tpu.memref_squeeze %30 : memref<1x!tpu.dma_semaphore, #tpu.memory_space<semaphore_mem>> -> memref<!tpu.dma_semaphore, #tpu.memory_space<semaphore_mem>>
    tpu.enqueue_dma source(%28 : memref<1x32xf32, #tpu.memory_space<any>>) target(%29 : memref<1x32xf32, #tpu.memory_space<vmem>>) target_semaphore(%31 : memref<!tpu.dma_semaphore, #tpu.memory_space<semaphore_mem>>)
    %c4_i32 = arith.constant 4 : i32
    %32 = arith.addi %3, %c4_i32 : i32
    %33 = arith.index_cast %32 : i32 to index
    %34 = memref.load %arg1[%33] : memref<8xi32, #tpu.memory_space<smem>>
    %c4_i32_18 = arith.constant 4 : i32
    %c0_i32_19 = arith.constant 0 : i32
    %35 = tpu.memref_slice %arg3[%34, %c0_i32_19] : memref<16x32xf32, #tpu.memory_space<any>> -> memref<1x32xf32, #tpu.memory_space<any>>
    %c4_i32_20 = arith.constant 4 : i32
    %c0_i32_21 = arith.constant 0 : i32
    %36 = tpu.memref_slice %arg5[%c4_i32_20, %c0_i32_21] : memref<8x32xf32, #tpu.memory_space<vmem>> -> memref<1x32xf32, #tpu.memory_space<vmem>>
    %37 = tpu.memref_slice %arg6[%c4_i32_18] : memref<8x!tpu.dma_semaphore, #tpu.memory_space<semaphore_mem>> -> memref<1x!tpu.dma_semaphore, #tpu.memory_space<semaphore_mem>>
    %38 = tpu.memref_squeeze %37 : memref<1x!tpu.dma_semaphore, #tpu.memory_space<semaphore_mem>> -> memref<!tpu.dma_semaphore, #tpu.memory_space<semaphore_mem>>
    tpu.enqueue_dma source(%35 : memref<1x32xf32, #tpu.memory_space<any>>) target(%36 : memref<1x32xf32, #tpu.memory_space<vmem>>) target_semaphore(%38 : memref<!tpu.dma_semaphore, #tpu.memory_space<semaphore_mem>>)
    %c5_i32 = arith.constant 5 : i32
    %39 = arith.addi %3, %c5_i32 : i32
    %40 = arith.index_cast %39 : i32 to index
    %41 = memref.load %arg1[%40] : memref<8xi32, #tpu.memory_space<smem>>
    %c5_i32_22 = arith.constant 5 : i32
    %c0_i32_23 = arith.constant 0 : i32
    %42 = tpu.memref_slice %arg3[%41, %c0_i32_23] : memref<16x32xf32, #tpu.memory_space<any>> -> memref<1x32xf32, #tpu.memory_space<any>>
    %c5_i32_24 = arith.constant 5 : i32
    %c0_i32_25 = arith.constant 0 : i32
    %43 = tpu.memref_slice %arg5[%c5_i32_24, %c0_i32_25] : memref<8x32xf32, #tpu.memory_space<vmem>> -> memref<1x32xf32, #tpu.memory_space<vmem>>
    %44 = tpu.memref_slice %arg6[%c5_i32_22] : memref<8x!tpu.dma_semaphore, #tpu.memory_space<semaphore_mem>> -> memref<1x!tpu.dma_semaphore, #tpu.memory_space<semaphore_mem>>
    %45 = tpu.memref_squeeze %44 : memref<1x!tpu.dma_semaphore, #tpu.memory_space<semaphore_mem>> -> memref<!tpu.dma_semaphore, #tpu.memory_space<semaphore_mem>>
    tpu.enqueue_dma source(%42 : memref<1x32xf32, #tpu.memory_space<any>>) target(%43 : memref<1x32xf32, #tpu.memory_space<vmem>>) target_semaphore(%45 : memref<!tpu.dma_semaphore, #tpu.memory_space<semaphore_mem>>)
    %c6_i32 = arith.constant 6 : i32
    %46 = arith.addi %3, %c6_i32 : i32
    %47 = arith.index_cast %46 : i32 to index
    %48 = memref.load %arg1[%47] : memref<8xi32, #tpu.memory_space<smem>>
    %c6_i32_26 = arith.constant 6 : i32
    %c0_i32_27 = arith.constant 0 : i32
    %49 = tpu.memref_slice %arg3[%48, %c0_i32_27] : memref<16x32xf32, #tpu.memory_space<any>> -> memref<1x32xf32, #tpu.memory_space<any>>
    %c6_i32_28 = arith.constant 6 : i32
    %c0_i32_29 = arith.constant 0 : i32
    %50 = tpu.memref_slice %arg5[%c6_i32_28, %c0_i32_29] : memref<8x32xf32, #tpu.memory_space<vmem>> -> memref<1x32xf32, #tpu.memory_space<vmem>>
    %51 = tpu.memref_slice %arg6[%c6_i32_26] : memref<8x!tpu.dma_semaphore, #tpu.memory_space<semaphore_mem>> -> memref<1x!tpu.dma_semaphore, #tpu.memory_space<semaphore_mem>>
    %52 = tpu.memref_squeeze %51 : memref<1x!tpu.dma_semaphore, #tpu.memory_space<semaphore_mem>> -> memref<!tpu.dma_semaphore, #tpu.memory_space<semaphore_mem>>
    tpu.enqueue_dma source(%49 : memref<1x32xf32, #tpu.memory_space<any>>) target(%50 : memref<1x32xf32, #tpu.memory_space<vmem>>) target_semaphore(%52 : memref<!tpu.dma_semaphore, #tpu.memory_space<semaphore_mem>>)
    %c7_i32 = arith.constant 7 : i32
    %53 = arith.addi %3, %c7_i32 : i32
    %54 = arith.index_cast %53 : i32 to index
    %55 = memref.load %arg1[%54] : memref<8xi32, #tpu.memory_space<smem>>
    %c7_i32_30 = arith.constant 7 : i32
    %c0_i32_31 = arith.constant 0 : i32
    %56 = tpu.memref_slice %arg3[%55, %c0_i32_31] : memref<16x32xf32, #tpu.memory_space<any>> -> memref<1x32xf32, #tpu.memory_space<any>>
    %c7_i32_32 = arith.constant 7 : i32
    %c0_i32_33 = arith.constant 0 : i32
    %57 = tpu.memref_slice %arg5[%c7_i32_32, %c0_i32_33] : memref<8x32xf32, #tpu.memory_space<vmem>> -> memref<1x32xf32, #tpu.memory_space<vmem>>
    %58 = tpu.memref_slice %arg6[%c7_i32_30] : memref<8x!tpu.dma_semaphore, #tpu.memory_space<semaphore_mem>> -> memref<1x!tpu.dma_semaphore, #tpu.memory_space<semaphore_mem>>
    %59 = tpu.memref_squeeze %58 : memref<1x!tpu.dma_semaphore, #tpu.memory_space<semaphore_mem>> -> memref<!tpu.dma_semaphore, #tpu.memory_space<semaphore_mem>>
    tpu.enqueue_dma source(%56 : memref<1x32xf32, #tpu.memory_space<any>>) target(%57 : memref<1x32xf32, #tpu.memory_space<vmem>>) target_semaphore(%59 : memref<!tpu.dma_semaphore, #tpu.memory_space<semaphore_mem>>)
    %c0_i32_34 = arith.constant 0 : i32
    %c0_i32_35 = arith.constant 0 : i32
    %c0_i32_36 = arith.constant 0 : i32
    %60 = tpu.memref_slice %arg3[%c0_i32_35, %c0_i32_36] : memref<16x32xf32, #tpu.memory_space<any>> -> memref<1x32xf32, #tpu.memory_space<any>>
    %c0_i32_37 = arith.constant 0 : i32
    %c0_i32_38 = arith.constant 0 : i32
    %61 = tpu.memref_slice %arg5[%c0_i32_37, %c0_i32_38] : memref<8x32xf32, #tpu.memory_space<vmem>> -> memref<1x32xf32, #tpu.memory_space<vmem>>
    %62 = tpu.memref_slice %arg6[%c0_i32_34] : memref<8x!tpu.dma_semaphore, #tpu.memory_space<semaphore_mem>> -> memref<1x!tpu.dma_semaphore, #tpu.memory_space<semaphore_mem>>
    %63 = tpu.memref_squeeze %62 : memref<1x!tpu.dma_semaphore, #tpu.memory_space<semaphore_mem>> -> memref<!tpu.dma_semaphore, #tpu.memory_space<semaphore_mem>>
    tpu.wait_dma2 semaphore(%63 : memref<!tpu.dma_semaphore, #tpu.memory_space<semaphore_mem>>) src(%60 : memref<1x32xf32, #tpu.memory_space<any>>) dst(%61 : memref<1x32xf32, #tpu.memory_space<vmem>>)
    %c1_i32_39 = arith.constant 1 : i32
    %c0_i32_40 = arith.constant 0 : i32
    %c0_i32_41 = arith.constant 0 : i32
    %64 = tpu.memref_slice %arg3[%c0_i32_40, %c0_i32_41] : memref<16x32xf32, #tpu.memory_space<any>> -> memref<1x32xf32, #tpu.memory_space<any>>
    %c1_i32_42 = arith.constant 1 : i32
    %c0_i32_43 = arith.constant 0 : i32
    %65 = tpu.memref_slice %arg5[%c1_i32_42, %c0_i32_43] : memref<8x32xf32, #tpu.memory_space<vmem>> -> memref<1x32xf32, #tpu.memory_space<vmem>>
    %66 = tpu.memref_slice %arg6[%c1_i32_39] : memref<8x!tpu.dma_semaphore, #tpu.memory_space<semaphore_mem>> -> memref<1x!tpu.dma_semaphore, #tpu.memory_space<semaphore_mem>>
    %67 = tpu.memref_squeeze %66 : memref<1x!tpu.dma_semaphore, #tpu.memory_space<semaphore_mem>> -> memref<!tpu.dma_semaphore, #tpu.memory_space<semaphore_mem>>
    tpu.wait_dma2 semaphore(%67 : memref<!tpu.dma_semaphore, #tpu.memory_space<semaphore_mem>>) src(%64 : memref<1x32xf32, #tpu.memory_space<any>>) dst(%65 : memref<1x32xf32, #tpu.memory_space<vmem>>)
    %c2_i32_44 = arith.constant 2 : i32
    %c0_i32_45 = arith.constant 0 : i32
    %c0_i32_46 = arith.constant 0 : i32
    %68 = tpu.memref_slice %arg3[%c0_i32_45, %c0_i32_46] : memref<16x32xf32, #tpu.memory_space<any>> -> memref<1x32xf32, #tpu.memory_space<any>>
    %c2_i32_47 = arith.constant 2 : i32
    %c0_i32_48 = arith.constant 0 : i32
    %69 = tpu.memref_slice %arg5[%c2_i32_47, %c0_i32_48] : memref<8x32xf32, #tpu.memory_space<vmem>> -> memref<1x32xf32, #tpu.memory_space<vmem>>
    %70 = tpu.memref_slice %arg6[%c2_i32_44] : memref<8x!tpu.dma_semaphore, #tpu.memory_space<semaphore_mem>> -> memref<1x!tpu.dma_semaphore, #tpu.memory_space<semaphore_mem>>
    %71 = tpu.memref_squeeze %70 : memref<1x!tpu.dma_semaphore, #tpu.memory_space<semaphore_mem>> -> memref<!tpu.dma_semaphore, #tpu.memory_space<semaphore_mem>>
    tpu.wait_dma2 semaphore(%71 : memref<!tpu.dma_semaphore, #tpu.memory_space<semaphore_mem>>) src(%68 : memref<1x32xf32, #tpu.memory_space<any>>) dst(%69 : memref<1x32xf32, #tpu.memory_space<vmem>>)
    %c3_i32_49 = arith.constant 3 : i32
    %c0_i32_50 = arith.constant 0 : i32
    %c0_i32_51 = arith.constant 0 : i32
    %72 = tpu.memref_slice %arg3[%c0_i32_50, %c0_i32_51] : memref<16x32xf32, #tpu.memory_space<any>> -> memref<1x32xf32, #tpu.memory_space<any>>
    %c3_i32_52 = arith.constant 3 : i32
    %c0_i32_53 = arith.constant 0 : i32
    %73 = tpu.memref_slice %arg5[%c3_i32_52, %c0_i32_53] : memref<8x32xf32, #tpu.memory_space<vmem>> -> memref<1x32xf32, #tpu.memory_space<vmem>>
    %74 = tpu.memref_slice %arg6[%c3_i32_49] : memref<8x!tpu.dma_semaphore, #tpu.memory_space<semaphore_mem>> -> memref<1x!tpu.dma_semaphore, #tpu.memory_space<semaphore_mem>>
    %75 = tpu.memref_squeeze %74 : memref<1x!tpu.dma_semaphore, #tpu.memory_space<semaphore_mem>> -> memref<!tpu.dma_semaphore, #tpu.memory_space<semaphore_mem>>
    tpu.wait_dma2 semaphore(%75 : memref<!tpu.dma_semaphore, #tpu.memory_space<semaphore_mem>>) src(%72 : memref<1x32xf32, #tpu.memory_space<any>>) dst(%73 : memref<1x32xf32, #tpu.memory_space<vmem>>)
    %c4_i32_54 = arith.constant 4 : i32
    %c0_i32_55 = arith.constant 0 : i32
    %c0_i32_56 = arith.constant 0 : i32
    %76 = tpu.memref_slice %arg3[%c0_i32_55, %c0_i32_56] : memref<16x32xf32, #tpu.memory_space<any>> -> memref<1x32xf32, #tpu.memory_space<any>>
    %c4_i32_57 = arith.constant 4 : i32
    %c0_i32_58 = arith.constant 0 : i32
    %77 = tpu.memref_slice %arg5[%c4_i32_57, %c0_i32_58] : memref<8x32xf32, #tpu.memory_space<vmem>> -> memref<1x32xf32, #tpu.memory_space<vmem>>
    %78 = tpu.memref_slice %arg6[%c4_i32_54] : memref<8x!tpu.dma_semaphore, #tpu.memory_space<semaphore_mem>> -> memref<1x!tpu.dma_semaphore, #tpu.memory_space<semaphore_mem>>
    %79 = tpu.memref_squeeze %78 : memref<1x!tpu.dma_semaphore, #tpu.memory_space<semaphore_mem>> -> memref<!tpu.dma_semaphore, #tpu.memory_space<semaphore_mem>>
    tpu.wait_dma2 semaphore(%79 : memref<!tpu.dma_semaphore, #tpu.memory_space<semaphore_mem>>) src(%76 : memref<1x32xf32, #tpu.memory_space<any>>) dst(%77 : memref<1x32xf32, #tpu.memory_space<vmem>>)
    %c5_i32_59 = arith.constant 5 : i32
    %c0_i32_60 = arith.constant 0 : i32
    %c0_i32_61 = arith.constant 0 : i32
    %80 = tpu.memref_slice %arg3[%c0_i32_60, %c0_i32_61] : memref<16x32xf32, #tpu.memory_space<any>> -> memref<1x32xf32, #tpu.memory_space<any>>
    %c5_i32_62 = arith.constant 5 : i32
    %c0_i32_63 = arith.constant 0 : i32
    %81 = tpu.memref_slice %arg5[%c5_i32_62, %c0_i32_63] : memref<8x32xf32, #tpu.memory_space<vmem>> -> memref<1x32xf32, #tpu.memory_space<vmem>>
    %82 = tpu.memref_slice %arg6[%c5_i32_59] : memref<8x!tpu.dma_semaphore, #tpu.memory_space<semaphore_mem>> -> memref<1x!tpu.dma_semaphore, #tpu.memory_space<semaphore_mem>>
    %83 = tpu.memref_squeeze %82 : memref<1x!tpu.dma_semaphore, #tpu.memory_space<semaphore_mem>> -> memref<!tpu.dma_semaphore, #tpu.memory_space<semaphore_mem>>
    tpu.wait_dma2 semaphore(%83 : memref<!tpu.dma_semaphore, #tpu.memory_space<semaphore_mem>>) src(%80 : memref<1x32xf32, #tpu.memory_space<any>>) dst(%81 : memref<1x32xf32, #tpu.memory_space<vmem>>)
    %c6_i32_64 = arith.constant 6 : i32
    %c0_i32_65 = arith.constant 0 : i32
    %c0_i32_66 = arith.constant 0 : i32
    %84 = tpu.memref_slice %arg3[%c0_i32_65, %c0_i32_66] : memref<16x32xf32, #tpu.memory_space<any>> -> memref<1x32xf32, #tpu.memory_space<any>>
    %c6_i32_67 = arith.constant 6 : i32
    %c0_i32_68 = arith.constant 0 : i32
    %85 = tpu.memref_slice %arg5[%c6_i32_67, %c0_i32_68] : memref<8x32xf32, #tpu.memory_space<vmem>> -> memref<1x32xf32, #tpu.memory_space<vmem>>
    %86 = tpu.memref_slice %arg6[%c6_i32_64] : memref<8x!tpu.dma_semaphore, #tpu.memory_space<semaphore_mem>> -> memref<1x!tpu.dma_semaphore, #tpu.memory_space<semaphore_mem>>
    %87 = tpu.memref_squeeze %86 : memref<1x!tpu.dma_semaphore, #tpu.memory_space<semaphore_mem>> -> memref<!tpu.dma_semaphore, #tpu.memory_space<semaphore_mem>>
    tpu.wait_dma2 semaphore(%87 : memref<!tpu.dma_semaphore, #tpu.memory_space<semaphore_mem>>) src(%84 : memref<1x32xf32, #tpu.memory_space<any>>) dst(%85 : memref<1x32xf32, #tpu.memory_space<vmem>>)
    %c7_i32_69 = arith.constant 7 : i32
    %c0_i32_70 = arith.constant 0 : i32
    %c0_i32_71 = arith.constant 0 : i32
    %88 = tpu.memref_slice %arg3[%c0_i32_70, %c0_i32_71] : memref<16x32xf32, #tpu.memory_space<any>> -> memref<1x32xf32, #tpu.memory_space<any>>
    %c7_i32_72 = arith.constant 7 : i32
    %c0_i32_73 = arith.constant 0 : i32
    %89 = tpu.memref_slice %arg5[%c7_i32_72, %c0_i32_73] : memref<8x32xf32, #tpu.memory_space<vmem>> -> memref<1x32xf32, #tpu.memory_space<vmem>>
    %90 = tpu.memref_slice %arg6[%c7_i32_69] : memref<8x!tpu.dma_semaphore, #tpu.memory_space<semaphore_mem>> -> memref<1x!tpu.dma_semaphore, #tpu.memory_space<semaphore_mem>>
    %91 = tpu.memref_squeeze %90 : memref<1x!tpu.dma_semaphore, #tpu.memory_space<semaphore_mem>> -> memref<!tpu.dma_semaphore, #tpu.memory_space<semaphore_mem>>
    tpu.wait_dma2 semaphore(%91 : memref<!tpu.dma_semaphore, #tpu.memory_space<semaphore_mem>>) src(%88 : memref<1x32xf32, #tpu.memory_space<any>>) dst(%89 : memref<1x32xf32, #tpu.memory_space<vmem>>)
    %c0 = arith.constant 0 : index
    %c0_74 = arith.constant 0 : index
    %92 = vector.load %arg5[%c0, %c0_74] : memref<8x32xf32, #tpu.memory_space<vmem>>, vector<8x32xf32>
    %c0_75 = arith.constant 0 : index
    %c0_76 = arith.constant 0 : index
    %93 = vector.load %arg2[%c0_75, %c0_76] : memref<8x32xf32, #tpu.memory_space<vmem>>, vector<8x32xf32>
    %94 = arith.mulf %92, %92 : vector<8x32xf32>
    %cst = arith.constant dense<0.000000e+00> : vector<8xf32>
    %95 = vector.multi_reduction <add>, %94, %cst [1] : vector<8x32xf32> to vector<8xf32>
    %96 = vector.shape_cast %95 : vector<8xf32> to vector<8x1xf32>
    %97 = arith.mulf %93, %93 : vector<8x32xf32>
    %cst_77 = arith.constant dense<0.000000e+00> : vector<8xf32>
    %98 = vector.multi_reduction <add>, %97, %cst_77 [1] : vector<8x32xf32> to vector<8xf32>
    %99 = vector.shape_cast %98 : vector<8xf32> to vector<8x1xf32>
    %100 = math.rsqrt %96 : vector<8x1xf32>
    %cst_78 = arith.constant 1.000000e+00 : f32
    %101 = vector.broadcast %cst_78 : f32 to vector<8x1xf32>
    %102 = arith.minimumf %100, %101 : vector<8x1xf32>
    %103 = math.rsqrt %99 : vector<8x1xf32>
    %cst_79 = arith.constant 1.000000e+00 : f32
    %104 = vector.broadcast %cst_79 : f32 to vector<8x1xf32>
    %105 = arith.minimumf %103, %104 : vector<8x1xf32>
    %106 = arith.subf %93, %92 : vector<8x32xf32>
    %107 = arith.mulf %106, %106 : vector<8x32xf32>
    %cst_80 = arith.constant dense<0.000000e+00> : vector<8xf32>
    %108 = vector.multi_reduction <add>, %107, %cst_80 [1] : vector<8x32xf32> to vector<8xf32>
    %109 = vector.shape_cast %108 : vector<8xf32> to vector<8x1xf32>
    %c8_i32_81 = arith.constant 8 : i32
    %110 = arith.muli %arg0, %c8_i32_81 : i32
    %111 = tpu.iota {dimensions = array<i32: 0>} : vector<8x1xi32>
    %112 = vector.broadcast %110 : i32 to vector<8x1xi32>
    %113 = arith.addi %112, %111 : vector<8x1xi32>
    %c8_i32_82 = arith.constant 8 : i32
    %114 = vector.broadcast %c8_i32_82 : i32 to vector<8x1xi32>
    %115 = arith.cmpi slt, %113, %114 : vector<8x1xi32>
    %116 = arith.extui %115 : vector<8x1xi1> to vector<8x1xi32>
    %117 = arith.sitofp %116 : vector<8x1xi32> to vector<8x1xf32>
    %118 = arith.mulf %109, %105 : vector<8x1xf32>
    %119 = arith.mulf %118, %102 : vector<8x1xf32>
    %120 = arith.mulf %119, %117 : vector<8x1xf32>
    %cst_83 = arith.constant dense<0.000000e+00> : vector<1xf32>
    %121 = vector.multi_reduction <add>, %120, %cst_83 [0] : vector<8x1xf32> to vector<1xf32>
    %122 = vector.shape_cast %121 : vector<1xf32> to vector<1x1xf32>
    %c0_84 = arith.constant 0 : index
    %c0_85 = arith.constant 0 : index
    %123 = vector.load %arg4[%c0_84, %c0_85] : memref<1x1xf32, #tpu.memory_space<vmem>>, vector<1x1xf32>
    %cst_86 = arith.constant 6.250000e-02 : f32
    %124 = vector.broadcast %cst_86 : f32 to vector<1x1xf32>
    %125 = arith.mulf %124, %122 : vector<1x1xf32>
    %126 = arith.addf %123, %125 : vector<1x1xf32>
    %c0_87 = arith.constant 0 : index
    %c0_88 = arith.constant 0 : index
    %127 = vector.load %arg4[%c0_87, %c0_88] : memref<1x1xf32, #tpu.memory_space<vmem>>, vector<1x1xf32>
    tpu.vector_store %arg4[%c0_87, %c0_88], %126 {strides = array<i32>} : memref<1x1xf32, #tpu.memory_space<vmem>>, vector<1x1xf32>,
    return
  }
  func.func @transform_0(%arg0: i32, %arg1: memref<8xi32, #tpu.memory_space<smem>>) -> (i32, i32) {
    %c0_i32 = arith.constant 0 : i32
    %c0_i32_0 = arith.constant 0 : i32
    return %arg0, %c0_i32 : i32, i32
  }
  func.func @transform_2(%arg0: i32, %arg1: memref<8xi32, #tpu.memory_space<smem>>) -> (i32, i32) {
    %c0_i32 = arith.constant 0 : i32
    %c0_i32_0 = arith.constant 0 : i32
    %c0_i32_1 = arith.constant 0 : i32
    return %c0_i32, %c0_i32_0 : i32, i32
  }
}

</mosaic_0001>

<bundles_post_ra>
// kernel: tpu_custom_call.1
= control target key start
LH: loop header
LB: loop body
LE: loop exit
PB: predicated region body
PF: predicated region fallthrough
CT: control target
= control target key end

     0   :  { %s819_s0 = inlined_call_operand.hbm [shape: s32[8], index: 0, kind: input, shape index: {}]   ;;  %s820_s1 = inlined_call_operand.hbm [shape: f32[8,32], index: 1, kind: input, shape index: {}]   ;;  %s821_s2 = inlined_call_operand.hbm [shape: f32[16,32], index: 2, kind: input, shape index: {}]   ;;  %s822_s3 = inlined_call_operand.hbm [shape: f32[1,1], index: 3, kind: output, shape index: {}]  }
   0x1   :  { %s350_s14 = scalar_lea.hbm %s819_s0, 16 }
   0x2   :  { %p351_p0 = scmp.ne.s32.totalorder %s819_s0, %s350_s14  ;;  %p354_p1 = scmp.lt.u32.totalorder %s350_s14, %s819_s0 }
   0x4   :  { %p356_p2 = pnand %p354_p1, %p351_p0 }
   0x6   :  { %359 = shalt.err (!%p356_p2)  }
   0x7   :  { %s618_s19 = smov [#allocation5]  }
   0x8   :  { %9 = dma.hbm_to_smem %s819_s0, 16, %s618_s19, [#allocation4] }
   0x9   :  { %596 = dma.done.wait [#allocation4], 16 }
   0xa   :  { %597 = vsyncadd [#allocation4], 4294967280 }
   0xb   :  { %11 = sfence }
   0xc   :  { %12 = vsyncpa [#allocation7], 0 }
   0xd   :  { %13 = vsyncpa [#allocation8], 0  ;;  %s619_s22 = smov [#allocation6]   ;;  %s360_s26 = scalar_lea.hbm %s820_s1, 128 }
   0xe   :  { %s20_s23 = sshll.u32 %s619_s22, 4  ;;  %p361_p3 = scmp.ne.s32.totalorder %s820_s1, %s360_s26  ;;  %s21_s23 = int_to_ptr.vmem [resolvable:$true] %s20_s23 }
   0xf   :  { %p364_p4 = scmp.lt.u32.totalorder %s360_s26, %s820_s1 }
  0x11   :  { %p366_p5 = pnand %p364_p4, %p361_p3 }
  0x13   :  { %369 = shalt.err (!%p366_p5)
}
  0x14   :  { %s370_s0 = scalar_lea.vmem %s21_s23, 128  ;;  %p375_p7 = scmp.lt.s32.totalorder %s21_s23, %s21_s23 }
  0x15   :  { %p371_p6 = scmp.ne.s32.totalorder %s21_s23, %s370_s0  ;;  %p376_p8 = scmp.lt.s32.totalorder %s370_s0, %s370_s0 }
  0x17   :  { %p377_p9 = por %p376_p8, %p375_p7 }
  0x19   :  { %p378_p10 = pnand %p377_p9, %p371_p6 }
  0x1b   :  { %381 = shalt.err (!%p378_p10)
}
  0x1c   :  { %23 = dma.hbm_to_vmem [thread:$0]  %s820_s1, 128, %s21_s23, [#allocation7]  }
  0x1d   :  { %598 = dma.done.wait [#allocation7], 128  }
  0x1e   :  { %599 = vsyncadd [#allocation7], 4294967168  ;;  %vm31_vm0 = vcmask 0   ;;  %s34_s6 = sld [smem:[#allocation5]]  ;;  %s620_s7 = smov [#allocation2]   ;;  %v621_v0 = vmov 0.0  }
  0x1f   :  { %s44_s8 = sshll.u32 %s620_s7, 4  ;;  %32 = vst.msk [vmem:[#allocation9] sm:$0x1] %vm31_vm0, %v621_v0  ;;  %s677_s9 = sld [smem:[#allocation5 + $0x1]]  ;;  %s675_s8 = int_to_ptr.vmem [resolvable:$true] %s44_s8 }
  0x20   :  { %s622_s10 = smov [#allocation2 + $0x1]   ;;  %s679_s12 = sld [smem:[#allocation5 + $0x2]] }
  0x21   :  { %s61_s11 = sshll.u32 %s622_s10, 4  ;;  %s623_s1 = smov [#allocation2 + $0x2]   ;;  %s681_s11 = int_to_ptr.vmem [resolvable:$true] %s61_s11 }
  0x22   :  { %s78_s13 = sshll.u32 %s623_s1, 4  ;;  %s683_s14 = sld [smem:[#allocation5 + $0x3]]  ;;  %s685_s13 = int_to_ptr.vmem [resolvable:$true] %s78_s13 }
  0x23   :  { %s624_s16 = smov [#allocation2 + $0x3]   ;;  %s696_s25 = scalar_lea.hbm %s821_s2, 256 }
  0x24   :  { %s311_s15 = sshll.u32 %s34_s6, 4  ;;  %s687_s17 = sshll.u32 %s624_s16, 4  ;;  %s96_s17 = int_to_ptr.vmem [resolvable:$true] %s687_s17 }
  0x25   :  { %s36_s20 = scalar_lea.hbm %s821_s2, %s311_s15  ;;  %s313_s21 = sshll.u32 %s677_s9, 4 }
  0x26   :  { %s382_s22 = scalar_lea.hbm %s36_s20, 16  ;;  %p385_p12 = scmp.lt.u32.totalorder %s36_s20, %s821_s2 }
  0x27   :  { %p383_p11 = scmp.ne.s32.totalorder %s36_s20, %s382_s22  ;;  %p386_p13 = scmp.lt.u32.totalorder %s696_s25, %s382_s22 }
  0x28   :  { %p388_p1 = scmp.lt.u32.totalorder %s382_s22, %s36_s20 }
  0x29   :  { %p387_p0 = por %p386_p13, %p385_p12 }
  0x2b   :  { %p389_p2 = por %p388_p1, %p387_p0 }
  0x2d   :  { %p390_p3 = pnand %p389_p2, %p383_p11 }
  0x2f   :  { %393 = shalt.err (!%p390_p3)  }
  0x30   :  { %s394_s28 = scalar_lea.vmem %s675_s8, 16  ;;  %s705_s29 = scalar_lea.vmem %s675_s8, 128 }
  0x31   :  { %p395_p4 = scmp.ne.s32.totalorder %s675_s8, %s394_s28  ;;  %p399_p5 = scmp.lt.s32.totalorder %s675_s8, %s675_s8 }
  0x32   :  { %p400_p6 = scmp.lt.s32.totalorder %s705_s29, %s394_s28 }
  0x34   :  { %p401_p7 = por %p400_p6, %p399_p5 }
  0x36   :  { %p402_p8 = pnand %p401_p7, %p395_p4 }
  0x38   :  { %405 = shalt.err (!%p402_p8)  }
  0x39   :  { %47 = dma.hbm_to_vmem [thread:$0]  %s36_s20, 16, %s675_s8, [#allocation3] }
  0x3a   :  { %s51_s4 = scalar_lea.hbm %s821_s2, %s313_s21  ;;  %s315_s5 = sshll.u32 %s679_s12, 4 }
  0x3b   :  { %s406_s6 = scalar_lea.hbm %s51_s4, 16  ;;  %p409_p10 = scmp.lt.u32.totalorder %s51_s4, %s821_s2 }
  0x3c   :  { %p407_p9 = scmp.ne.s32.totalorder %s51_s4, %s406_s6  ;;  %p410_p11 = scmp.lt.u32.totalorder %s696_s25, %s406_s6 }
  0x3d   :  { %p412_p13 = scmp.lt.u32.totalorder %s406_s6, %s51_s4 }
  0x3e   :  { %p411_p12 = por %p410_p11, %p409_p10 }
  0x40   :  { %p413_p0 = por %p412_p13, %p411_p12 }
  0x42   :  { %p414_p1 = pnand %p413_p0, %p407_p9 }
  0x44   :  { %417 = shalt.err (!%p414_p1)  }
  0x45   :  { %s418_s10 = scalar_lea.vmem %s681_s11, 16  ;;  %p423_p3 = scmp.lt.s32.totalorder %s681_s11, %s675_s8 }
  0x46   :  { %p419_p2 = scmp.ne.s32.totalorder %s681_s11, %s418_s10  ;;  %p424_p4 = scmp.lt.s32.totalorder %s705_s29, %s418_s10 }
  0x48   :  { %p425_p5 = por %p424_p4, %p423_p3 }
  0x4a   :  { %p426_p6 = pnand %p425_p5, %p419_p2 }
  0x4c   :  { %429 = shalt.err (!%p426_p6)  }
  0x4d   :  { %64 = dma.hbm_to_vmem [thread:$0]  %s51_s4, 16, %s681_s11, [#allocation3 + $0x1] }
  0x4e   :  { %s68_s15 = scalar_lea.hbm %s821_s2, %s315_s5  ;;  %s317_s16 = sshll.u32 %s683_s14, 4 }
  0x4f   :  { %s430_s18 = scalar_lea.hbm %s68_s15, 16  ;;  %p433_p8 = scmp.lt.u32.totalorder %s68_s15, %s821_s2 }
  0x50   :  { %p431_p7 = scmp.ne.s32.totalorder %s68_s15, %s430_s18  ;;  %p434_p9 = scmp.lt.u32.totalorder %s696_s25, %s430_s18 }
  0x51   :  { %p436_p11 = scmp.lt.u32.totalorder %s430_s18, %s68_s15 }
  0x52   :  { %p435_p10 = por %p434_p9, %p433_p8 }
  0x54   :  { %p437_p12 = por %p436_p11, %p435_p10 }
  0x56   :  { %p438_p13 = pnand %p437_p12, %p431_p7 }
  0x58   :  { %441 = shalt.err (!%p438_p13)  }
  0x59   :  { %s442_s11 = scalar_lea.vmem %s685_s13, 16  ;;  %p447_p1 = scmp.lt.s32.totalorder %s685_s13, %s675_s8 }
  0x5a   :  { %p443_p0 = scmp.ne.s32.totalorder %s685_s13, %s442_s11  ;;  %p448_p2 = scmp.lt.s32.totalorder %s705_s29, %s442_s11 }
  0x5c   :  { %p449_p3 = por %p448_p2, %p447_p1 }
  0x5e   :  { %p450_p4 = pnand %p449_p3, %p443_p0 }
  0x60   :  { %453 = shalt.err (!%p450_p4)  }
  0x61   :  { %81 = dma.hbm_to_vmem [thread:$0]  %s68_s15, 16, %s685_s13, [#allocation3 + $0x2] }
  0x62   :  { %s85_s22 = scalar_lea.hbm %s821_s2, %s317_s16 }
  0x63   :  { %s454_s23 = scalar_lea.hbm %s85_s22, 16  ;;  %p457_p6 = scmp.lt.u32.totalorder %s85_s22, %s821_s2 }
  0x64   :  { %p455_p5 = scmp.ne.s32.totalorder %s85_s22, %s454_s23  ;;  %p458_p7 = scmp.lt.u32.totalorder %s696_s25, %s454_s23 }
  0x65   :  { %p460_p9 = scmp.lt.u32.totalorder %s454_s23, %s85_s22 }
  0x66   :  { %p459_p8 = por %p458_p7, %p457_p6 }
  0x68   :  { %p461_p10 = por %p460_p9, %p459_p8 }
  0x6a   :  { %p462_p11 = pnand %p461_p10, %p455_p5 }
  0x6c   :  { %465 = shalt.err (!%p462_p11)  }
  0x6d   :  { %s466_s27 = scalar_lea.vmem %s96_s17, 16  ;;  %p471_p13 = scmp.lt.s32.totalorder %s96_s17, %s675_s8 }
  0x6e   :  { %p467_p12 = scmp.ne.s32.totalorder %s96_s17, %s466_s27  ;;  %p472_p0 = scmp.lt.s32.totalorder %s705_s29, %s466_s27 }
  0x70   :  { %p473_p1 = por %p472_p0, %p471_p13 }
  0x72   :  { %p474_p2 = pnand %p473_p1, %p467_p12 }
  0x74   :  { %477 = shalt.err (!%p474_p2)  }
  0x75   :  { %98 = dma.hbm_to_vmem [thread:$0]  %s85_s22, 16, %s96_s17, [#allocation3 + $0x3] }
  0x76   :  { %s318_s13 = sld [smem:[#allocation5 + $0x4]]  ;;  %s625_s28 = smov [#allocation2 + $0x4]  }
  0x77   :  { %s112_s30 = sshll.u32 %s625_s28, 4  ;;  %s749_s0 = sld [smem:[#allocation5 + $0x5]]  ;;  %s113_s30 = int_to_ptr.vmem [resolvable:$true] %s112_s30 }
  0x78   :  { %s626_s4 = smov [#allocation2 + $0x5]   ;;  %s751_s6 = sld [smem:[#allocation5 + $0x6]] }
  0x79   :  { %s129_s5 = sshll.u32 %s626_s4, 4  ;;  %s627_s7 = smov [#allocation2 + $0x6]   ;;  %s753_s5 = int_to_ptr.vmem [resolvable:$true] %s129_s5 }
  0x7a   :  { %s146_s9 = sshll.u32 %s627_s7, 4  ;;  %s755_s10 = sld [smem:[#allocation5 + $0x7]]  ;;  %s757_s9 = int_to_ptr.vmem [resolvable:$true] %s146_s9 }
  0x7c   :  { %s319_s12 = sshll.u32 %s318_s13, 4 }
  0x7d   :  { %s102_s15 = scalar_lea.hbm %s821_s2, %s319_s12  ;;  %s321_s16 = sshll.u32 %s749_s0, 4 }
  0x7e   :  { %s478_s18 = scalar_lea.hbm %s102_s15, 16  ;;  %p481_p4 = scmp.lt.u32.totalorder %s102_s15, %s821_s2 }
  0x7f   :  { %p479_p3 = scmp.ne.s32.totalorder %s102_s15, %s478_s18  ;;  %p482_p5 = scmp.lt.u32.totalorder %s696_s25, %s478_s18 }
  0x80   :  { %p484_p7 = scmp.lt.u32.totalorder %s478_s18, %s102_s15 }
  0x81   :  { %p483_p6 = por %p482_p5, %p481_p4 }
  0x83   :  { %p485_p8 = por %p484_p7, %p483_p6 }
  0x85   :  { %p486_p9 = pnand %p485_p8, %p479_p3 }
  0x87   :  { %489 = shalt.err (!%p486_p9)  }
  0x88   :  { %s490_s11 = scalar_lea.vmem %s113_s30, 16  ;;  %p495_p11 = scmp.lt.s32.totalorder %s113_s30, %s675_s8 }
  0x89   :  { %p491_p10 = scmp.ne.s32.totalorder %s113_s30, %s490_s11  ;;  %p496_p12 = scmp.lt.s32.totalorder %s705_s29, %s490_s11 }
  0x8b   :  { %p497_p13 = por %p496_p12, %p495_p11 }
  0x8d   :  { %p498_p0 = pnand %p497_p13, %p491_p10 }
  0x8f   :  { %501 = shalt.err (!%p498_p0)  }
  0x90   :  { %115 = dma.hbm_to_vmem [thread:$0]  %s102_s15, 16, %s113_s30, [#allocation3 + $0x4] }
  0x91   :  { %s119_s22 = scalar_lea.hbm %s821_s2, %s321_s16  ;;  %s323_s23 = sshll.u32 %s751_s6, 4 }
  0x92   :  { %s502_s24 = scalar_lea.hbm %s119_s22, 16  ;;  %p505_p2 = scmp.lt.u32.totalorder %s119_s22, %s821_s2 }
  0x93   :  { %p503_p1 = scmp.ne.s32.totalorder %s119_s22, %s502_s24  ;;  %p506_p3 = scmp.lt.u32.totalorder %s696_s25, %s502_s24 }
  0x94   :  { %p508_p5 = scmp.lt.u32.totalorder %s502_s24, %s119_s22 }
  0x95   :  { %p507_p4 = por %p506_p3, %p505_p2 }
  0x97   :  { %p509_p6 = por %p508_p5, %p507_p4 }
  0x99   :  { %p510_p7 = pnand %p509_p6, %p503_p1 }
  0x9b   :  { %513 = shalt.err (!%p510_p7)  }
  0x9c   :  { %s514_s13 = scalar_lea.vmem %s753_s5, 16  ;;  %p519_p9 = scmp.lt.s32.totalorder %s753_s5, %s675_s8 }
  0x9d   :  { %p515_p8 = scmp.ne.s32.totalorder %s753_s5, %s514_s13  ;;  %p520_p10 = scmp.lt.s32.totalorder %s705_s29, %s514_s13 }
  0x9f   :  { %p521_p11 = por %p520_p10, %p519_p9 }
  0xa1   :  { %p522_p12 = pnand %p521_p11, %p515_p8 }
  0xa3   :  { %525 = shalt.err (!%p522_p12)  }
  0xa4   :  { %132 = dma.hbm_to_vmem [thread:$0]  %s119_s22, 16, %s753_s5, [#allocation3 + $0x5] }
  0xa5   :  { %s136_s0 = scalar_lea.hbm %s821_s2, %s323_s23  ;;  %s325_s4 = sshll.u32 %s755_s10, 4 }
  0xa6   :  { %s526_s6 = scalar_lea.hbm %s136_s0, 16  ;;  %p529_p0 = scmp.lt.u32.totalorder %s136_s0, %s821_s2 }
  0xa7   :  { %p527_p13 = scmp.ne.s32.totalorder %s136_s0, %s526_s6  ;;  %p530_p1 = scmp.lt.u32.totalorder %s696_s25, %s526_s6 }
  0xa8   :  { %p532_p3 = scmp.lt.u32.totalorder %s526_s6, %s136_s0 }
  0xa9   :  { %p531_p2 = por %p530_p1, %p529_p0 }
  0xab   :  { %p533_p4 = por %p532_p3, %p531_p2 }
  0xad   :  { %p534_p5 = pnand %p533_p4, %p527_p13 }
  0xaf   :  { %537 = shalt.err (!%p534_p5)  }
  0xb0   :  { %s538_s5 = scalar_lea.vmem %s757_s9, 16  ;;  %p543_p7 = scmp.lt.s32.totalorder %s757_s9, %s675_s8 }
  0xb1   :  { %p539_p6 = scmp.ne.s32.totalorder %s757_s9, %s538_s5  ;;  %p544_p8 = scmp.lt.s32.totalorder %s705_s29, %s538_s5 }
  0xb3   :  { %p545_p9 = por %p544_p8, %p543_p7 }
  0xb5   :  { %p546_p10 = pnand %p545_p9, %p539_p6 }
  0xb7   :  { %549 = shalt.err (!%p546_p10)  }
  0xb8   :  { %149 = dma.hbm_to_vmem [thread:$0]  %s136_s0, 16, %s757_s9, [#allocation3 + $0x6] }
  0xb9   :  { %s153_s1 = scalar_lea.hbm %s821_s2, %s325_s4  ;;  %s628_s15 = smov [#allocation2 + $0x7]  }
  0xba   :  { %s163_s16 = sshll.u32 %s628_s15, 4  ;;  %s550_s18 = scalar_lea.hbm %s153_s1, 16  ;;  %s164_s16 = int_to_ptr.vmem [resolvable:$true] %s163_s16 }
  0xbb   :  { %p551_p11 = scmp.ne.s32.totalorder %s153_s1, %s550_s18  ;;  %p553_p12 = scmp.lt.u32.totalorder %s153_s1, %s821_s2 }
  0xbc   :  { %p554_p13 = scmp.lt.u32.totalorder %s696_s25, %s550_s18  ;;  %p556_p1 = scmp.lt.u32.totalorder %s550_s18, %s153_s1 }
  0xbe   :  { %p555_p0 = por %p554_p13, %p553_p12 }
  0xc0   :  { %p557_p2 = por %p556_p1, %p555_p0 }
  0xc2   :  { %p558_p3 = pnand %p557_p2, %p551_p11 }
  0xc4   :  { %561 = shalt.err (!%p558_p3)  }
  0xc5   :  { %s562_s9 = scalar_lea.vmem %s164_s16, 16  ;;  %p567_p5 = scmp.lt.s32.totalorder %s164_s16, %s675_s8 }
  0xc6   :  { %p563_p4 = scmp.ne.s32.totalorder %s164_s16, %s562_s9  ;;  %p568_p6 = scmp.lt.s32.totalorder %s705_s29, %s562_s9 }
  0xc8   :  { %p569_p7 = por %p568_p6, %p567_p5 }
  0xca   :  { %p570_p8 = pnand %p569_p7, %p563_p4 }
  0xcc   :  { %573 = shalt.err (!%p570_p8)  }
  0xcd   :  { %166 = dma.hbm_to_vmem [thread:$0]  %s153_s1, 16, %s164_s16, [#allocation3 + $0x7] }
  0xce   :  { %600 = dma.done.wait [#allocation3], 16 }
  0xcf   :  { %601 = vsyncadd [#allocation3], 4294967280 }
  0xd0   :  { %602 = dma.done.wait [#allocation3 + $0x1], 16 }
  0xd1   :  { %603 = vsyncadd [#allocation3 + $0x1], 4294967280 }
  0xd2   :  { %604 = dma.done.wait [#allocation3 + $0x2], 16 }
  0xd3   :  { %605 = vsyncadd [#allocation3 + $0x2], 4294967280 }
  0xd4   :  { %606 = dma.done.wait [#allocation3 + $0x3], 16 }
  0xd5   :  { %607 = vsyncadd [#allocation3 + $0x3], 4294967280 }
  0xd6   :  { %608 = dma.done.wait [#allocation3 + $0x4], 16 }
  0xd7   :  { %609 = vsyncadd [#allocation3 + $0x4], 4294967280 }
  0xd8   :  { %610 = dma.done.wait [#allocation3 + $0x5], 16 }
  0xd9   :  { %611 = vsyncadd [#allocation3 + $0x5], 4294967280 }
  0xda   :  { %612 = dma.done.wait [#allocation3 + $0x6], 16 }
  0xdb   :  { %613 = vsyncadd [#allocation3 + $0x6], 4294967280 }
  0xdc   :  { %614 = dma.done.wait [#allocation3 + $0x7], 16 }
  0xdd   :  { %615 = vsyncadd [#allocation3 + $0x7], 4294967280  ;;  %v185_v1 = vld [vmem:[#allocation6] sm:$0xff]  ;;  %vm187_vm1 = vcmask 261120   ;;  %v184_v2 = vld [vmem:[#allocation2] sm:$0xff]  ;;  %s629_s2 = smov [#allocation9]  }
  0xde   :  { %v191_v3 = vmul.f32 %v185_v1, %v185_v1  ;;  %v186_v4 = vmul.f32 %v184_v2, %v184_v2  ;;  %v199_v5 = vsub.f32 %v185_v1, %v184_v2  ;;  %v220_v25 = vld [vmem:[#allocation9] sm:$0x1]  ;;  %s231_s8 = sshll.u32 %s629_s2, 4  ;;  %s232_s8 = int_to_ptr.vmem [resolvable:$true] %s231_s8 }
  0xdf   :  { %s574_s25 = scalar_lea.vmem %s232_s8, 16  ;;  %s578_s29 = scalar_lea.vmem %s232_s8, 32 }
  0xe0   :  { %v192_v6 = vsel %vm187_vm1, %v191_v3, 0.0  ;;  %v200_v7 = vmul.f32 %v199_v5, %v199_v5  ;;  %v188_v8 = vsel %vm187_vm1, %v186_v4, 0.0  ;;  %p575_p9 = scmp.ne.s32.totalorder %s232_s8, %s574_s25  ;;  %p579_p10 = scmp.lt.s32.totalorder %s232_s8, %s232_s8 }
  0xe1   :  { %193 = vadd.xlane.f32.xlu0 %v192_v6  ;;  %p580_p11 = scmp.lt.s32.totalorder %s578_s29, %s574_s25 }
  0xe2   :  { %v201_v9 = vsel %vm187_vm1, %v200_v7, 0.0 }
  0xe3   :  { %202 = vadd.xlane.f32.xlu1 %v201_v9  ;;  %p581_p12 = por %p580_p11, %p579_p10 }
  0xe5   :  { %189 = vadd.xlane.f32.xlu0 %v188_v8  ;;  %p582_p13 = pnand %p581_p12, %p575_p9 }
 0x16e   :  { %v194_v10 = vpop.xlane.xlu0 %193 }
 0x16f   :  { %346 = vrsqrt.f32 %v194_v10 }
 0x170   :  { %v203_v14 = vpop.xlane.xlu1 %202 }
 0x172   :  { %v190_v11 = vpop.xlane.xlu0 %189 }
 0x173   :  { %348 = vrsqrt.f32 %v190_v11 }
 0x179   :  { %v347_v12 = vpop.eup %346 }
 0x17a   :  { %v198_v13 = vmin.f32 %v347_v12, 1.0 }
 0x17c   :  { %v211_v17 = vmul.f32 %v203_v14, %v198_v13 }
 0x17d   :  { %v349_v15 = vpop.eup %348 }
 0x17e   :  { %v196_v16 = vmin.f32 %v349_v15, 1.0 }
 0x180   :  { %v212_v18 = vmul.f32 %v211_v17, %v196_v16 }
 0x182   :  { %v214_v19 = vrot.slane %v212_v18, 4 }
 0x184   :  { %v215_v20 = vadd.f32 %v214_v19, %v212_v18 }
 0x186   :  { %v216_v21 = vrot.slane %v215_v20, 2 }
 0x188   :  { %v217_v22 = vadd.f32 %v216_v21, %v215_v20 }
 0x18a   :  { %v218_v23 = vrot.slane %v217_v22, 1 }
 0x18c   :  { %v219_v24 = vadd.f32 %v218_v23, %v217_v22 }
 0x18e   :  { %v221_v26 = vmul.f32 0.0625, %v219_v24 }
 0x190   :  { %v222_v27 = vadd.f32 %v221_v26, %v220_v25 }
 0x192   :  { %224 = vst.msk [vmem:[#allocation9] sm:$0x1] %vm31_vm0, %v222_v27 }
 0x193   :  { %585 = shalt.err (!%p582_p13)
}
 0x194   :  { %s586_s21 = scalar_lea.hbm %s822_s3, 16 }
 0x195   :  { %p587_p0 = scmp.ne.s32.totalorder %s822_s3, %s586_s21  ;;  %p590_p1 = scmp.lt.u32.totalorder %s586_s21, %s822_s3 }
 0x197   :  { %p592_p2 = pnand %p590_p1, %p587_p0 }
 0x199   :  { %595 = shalt.err (!%p592_p2)
}
 0x19a   :  { %234 = dma.vmem_to_hbm [thread:$0]  %s232_s8, 16, %s822_s3, [#allocation8]  }
 0x19b   :  { %616 = dma.done.wait [#allocation8], 16  }
 0x19c   :  { %617 = vsyncadd [#allocation8], 4294967280 }
 0x19d   :  { %238 = vsyncpa [#allocation7], 1 }
 0x19e   :  { %239 = vsyncpa [#allocation8], 1 }
 0x19f   :  { %240 = vsyncmov [#allocation3] }
 0x1a2   :  { %s241_s28 = vpop.sfrf %240 }
 0x1a3   :  { %p326_p3 = scmp.ne.s32.totalorder %s241_s28, 0 }
 0x1a5   :  { %245 = shalt.err (%p326_p3)  }
 0x1a6   :  { %247 = vsyncmov [#allocation3 + $0x1] }
 0x1a9   :  { %s248_s30 = vpop.sfrf %247 }
 0x1aa   :  { %p327_p4 = scmp.ne.s32.totalorder %s248_s30, 0 }
 0x1ac   :  { %252 = shalt.err (%p327_p4)  }
 0x1ad   :  { %254 = vsyncmov [#allocation3 + $0x2] }
 0x1b0   :  { %s255_s0 = vpop.sfrf %254 }
 0x1b1   :  { %p328_p5 = scmp.ne.s32.totalorder %s255_s0, 0 }
 0x1b3   :  { %259 = shalt.err (%p328_p5)  }
 0x1b4   :  { %261 = vsyncmov [#allocation3 + $0x3] }
 0x1b7   :  { %s262_s4 = vpop.sfrf %261 }
 0x1b8   :  { %p329_p6 = scmp.ne.s32.totalorder %s262_s4, 0 }
 0x1ba   :  { %266 = shalt.err (%p329_p6)  }
 0x1bb   :  { %268 = vsyncmov [#allocation3 + $0x4] }
 0x1be   :  { %s269_s3 = vpop.sfrf %268 }
 0x1bf   :  { %p330_p7 = scmp.ne.s32.totalorder %s269_s3, 0 }
 0x1c1   :  { %273 = shalt.err (%p330_p7)  }
 0x1c2   :  { %275 = vsyncmov [#allocation3 + $0x5] }
 0x1c5   :  { %s276_s6 = vpop.sfrf %275 }
 0x1c6   :  { %p331_p8 = scmp.ne.s32.totalorder %s276_s6, 0 }
 0x1c8   :  { %280 = shalt.err (%p331_p8)  }
 0x1c9   :  { %282 = vsyncmov [#allocation3 + $0x6] }
 0x1cc   :  { %s283_s7 = vpop.sfrf %282 }
 0x1cd   :  { %p332_p9 = scmp.ne.s32.totalorder %s283_s7, 0 }
 0x1cf   :  { %287 = shalt.err (%p332_p9)  }
 0x1d0   :  { %289 = vsyncmov [#allocation3 + $0x7] }
 0x1d3   :  { %s290_s12 = vpop.sfrf %289 }
 0x1d4   :  { %p333_p10 = scmp.ne.s32.totalorder %s290_s12, 0 }
 0x1d6   :  { %294 = shalt.err (%p333_p10)  }

</bundles_post_ra>
